<compile_context>
chip_gen: v7x
topology: tpu7x:2x2x1
jax: 0.10.0
libtpu: 0.0.40
codegen_flags: <defaults>
</compile_context>

<pallas_src>
import functools

import jax
import jax.numpy as jnp
import numpy as np
from jax.experimental import pallas as pl
from jax.experimental.pallas import tpu as pltpu


def _round_up(a, m):
    return ((a + m - 1) // m) * m


def _pick_block_b(b, per_image_scratch_bytes, budget_bytes=4 << 20, hard_cap=8):
    """Images packed per grid step (lane-axis batch packing).

    Largest divisor of b that (a) keeps >= 2 grid steps when b >= 2 so both
    v7x TensorCores get work through the "parallel" grid axis, and (b) keeps
    the stacked-operand scratch under a small VMEM budget.
    """
    cap = max(1, min(hard_cap, budget_bytes // max(per_image_scratch_bytes, 1)))
    best = 1
    for d in range(1, min(b, cap) + 1):
        if b % d == 0 and (b // d >= 2 or b == 1):
            best = d
    return best


def _aconv_kernel(xf_ref, attw_ref, attb_ref, w_ref, out_ref, stk_ref, *,
                  k, n, Wp, L_pad, BB):
    """One grid step = BB images, fused on the lane axis (Ncols = BB * L_pad)."""
    K = k * k * n

    # 1) Stage the stacked operand (K rows = tap-major (kh,kw,channel), f32)
    #    into VMEM scratch.  The image is loaded ONCE per bb; each tap is a
    #    static lane shift of the in-register value (XLU rotate/select), stored
    #    straight to scratch so nothing stays live across the softmax.
    for bb in range(BB):
        xfb = xf_ref[bb]                                   # (n, F) bf16
        c0 = bb * L_pad
        for kh in range(k):
            for kw in range(k):
                kk = kh * k + kw
                off = kh * Wp + kw
                shifted = xfb[:, off:off + L_pad]          # (n, L_pad) bf16
                stk_ref[kk * n:(kk + 1) * n, c0:c0 + L_pad] = (
                    shifted.astype(jnp.float32))

    stk = stk_ref[...]                                     # (K, Ncols) f32
    stk_bf = stk.astype(jnp.bfloat16)

    # 2) Attention logits: a single (K,K)@(K,Ncols) MXU matmul.  attw rows are
    #    pre-replicated over channels in the wrapper, so row r corresponds to
    #    attention channel r // n.
    logits = jnp.dot(attw_ref[...], stk_bf,
                     preferred_element_type=jnp.float32) + attb_ref[...]

    # 3) Softmax over the k*k attention channels (rows are exact n-fold
    #    replicas, so sum over all K rows equals n * sum over channels).
    m = jnp.max(logits, axis=0, keepdims=True)
    e = jnp.exp(logits - m)
    s = jnp.sum(e, axis=0, keepdims=True) * (1.0 / n)
    att = e * pl.reciprocal(s, approx=True)                # (K, Ncols) f32

    # 4) Attention-weighted operand + single main-conv MXU matmul.
    atx = (stk * att).astype(jnp.bfloat16)
    y = jnp.dot(w_ref[...], atx,
                preferred_element_type=jnp.float32)        # (o_f, Ncols) f32

    # 5) Lane-dense bf16 stores (one aligned (o_f, L_pad) slab per image).
    for bb in range(BB):
        c0 = bb * L_pad
        out_ref[bb] = y[:, c0:c0 + L_pad].astype(jnp.bfloat16)


@functools.partial(jax.jit, static_argnames=("kernel_size", "stride", "padding"))
def aconv_forward(x, weight, att_weight, att_bias, *, kernel_size, stride=1,
                  padding=0):
    b, n, H, W = x.shape
    k = kernel_size
    k2 = k * k
    K = k2 * n
    o_f = weight.shape[0]
    n_H = 1 + (H + 2 * padding - k) // stride
    n_W = 1 + (W + 2 * padding - k) // stride
    Hp, Wp = H + 2 * padding, W + 2 * padding

    # Dense (stride-1) output grid computed in-kernel; valid strided positions
    # are selected afterwards.  Column p = r*Wp + c is the window at padded
    # position (r, c).
    R = Hp - k + 1                       # dense rows
    L = R * Wp                           # dense flat columns per image
    L_pad = _round_up(L, 256)            # matmul N dim: 256-aligned (v6e/v7x MXU)
    max_off = (k - 1) * Wp + (k - 1)     # largest static shift used in-kernel
    F = _round_up(max(Hp * Wp, max_off + L_pad), 128)

    BB = _pick_block_b(b, K * L_pad * 4)
    G = b // BB

    # Flattened, zero-padded image in bf16 (dominant HBM stream: read once).
    xp = jnp.pad(x, ((0, 0), (0, 0), (padding, padding), (padding, padding)))
    xf = xp.reshape(b, n, Hp * Wp)
    xf = jnp.pad(xf, ((0, 0), (0, 0), (0, F - Hp * Wp))).astype(jnp.bfloat16)

    # Lane-dense weights with stacked-row order row = (kh*k + kw)*n + c.
    # Attention rows are pre-replicated over the n channels so the in-kernel
    # softmax / attention-apply needs no sublane reshape.
    attw_mat = att_weight.transpose(0, 2, 3, 1).reshape(k2, K)
    attw_exp = jnp.repeat(attw_mat, n, axis=0).astype(jnp.bfloat16)       # (K, K)
    attb_exp = jnp.repeat(att_bias, n).reshape(K, 1).astype(jnp.float32)  # (K, 1)
    w_mat = weight.transpose(0, 2, 3, 1).reshape(o_f, K).astype(jnp.bfloat16)

    kern = functools.partial(_aconv_kernel, k=k, n=n, Wp=Wp, L_pad=L_pad, BB=BB)

    Ncols = BB * L_pad
    flops = 2 * G * Ncols * K * (K + o_f) + 10 * G * K * Ncols
    bytes_accessed = (b * n * F * 2 + K * K * 2 + o_f * K * 2 + K * 4
                      + b * o_f * L_pad * 2)
    cost = pl.CostEstimate(flops=int(flops),
                           transcendentals=int(G * K * Ncols),
                           bytes_accessed=int(bytes_accessed))

    y_flat = pl.pallas_call(
        kern,
        out_shape=jax.ShapeDtypeStruct((b, o_f, L_pad), jnp.bfloat16),
        grid_spec=pltpu.PrefetchScalarGridSpec(
            num_scalar_prefetch=0,
            grid=(G,),
            in_specs=[
                pl.BlockSpec((BB, n, F), lambda g: (g, 0, 0)),
                pl.BlockSpec((K, K), lambda g: (0, 0)),     # resident weights
                pl.BlockSpec((K, 1), lambda g: (0, 0)),
                pl.BlockSpec((o_f, K), lambda g: (0, 0)),
            ],
            out_specs=pl.BlockSpec((BB, o_f, L_pad), lambda g: (g, 0, 0)),
            scratch_shapes=[pltpu.VMEM((K, Ncols), jnp.float32)],
        ),
        compiler_params=pltpu.CompilerParams(dimension_semantics=("parallel",)),
        cost_estimate=cost,
    )(xf, attw_exp, attb_exp, w_mat)

    # Keep only the valid (strided) output positions; result is NCHW float32.
    y = y_flat[:, :, :L].astype(jnp.float32).reshape(b, o_f, R, Wp)
    y = y[:, :, 0:(n_H - 1) * stride + 1:stride, 0:(n_W - 1) * stride + 1:stride]
    return y


# ----------------------------- reference path ------------------------------ #

def _extract_patches(x, k, stride, padding, n_H, n_W):
    """F.unfold equivalent: (b, n*k*k, P) with row index c*k*k + kh*k + kw."""
    b, n, _, _ = x.shape
    xp = jnp.pad(x, ((0, 0), (0, 0), (padding, padding), (padding, padding)))
    cols = []
    for kh in range(k):
        for kw in range(k):
            cols.append(xp[:, :, kh:kh + stride * n_H:stride,
                               kw:kw + stride * n_W:stride])
    patches = jnp.stack(cols, axis=2)                    # (b, n, k2, n_H, n_W)
    return patches.reshape(b, n * k * k, n_H * n_W)


def aconv_reference(x, weight, att_weight, att_bias, *, kernel_size, stride=1,
                    padding=0):
    """Pure-JAX f32 reference mirroring the PyTorch forward (same SoftAttn stand-in)."""
    b, n, H, W = x.shape
    k = kernel_size
    k2 = k * k
    o_f = weight.shape[0]
    n_H = 1 + (H + 2 * padding - k) // stride
    n_W = 1 + (W + 2 * padding - k) // stride

    kx = _extract_patches(x, k, stride, padding, n_H, n_W)          # (b,nkk,P)
    attw = att_weight.reshape(k2, n * k2)
    logits = jnp.einsum('jc,bcp->bjp', attw, kx) + att_bias[None, :, None]
    att = jax.nn.softmax(logits, axis=1)                             # (b,k2,P)
    att_full = jnp.tile(att, (1, n, 1))                              # (b,nkk,P)
    atx = att_full * kx
    w = weight.reshape(o_f, n * k2)
    y = jnp.einsum('oc,bcp->bop', w, atx)                            # (b,o_f,P)
    return y.reshape(b, o_f, n_H, n_W)


if __name__ == "__main__":
    b, n, H, W = 2, 4, 16, 16
    o_f, k, stride, padding = 8, 3, 1, 1

    key = jax.random.PRNGKey(0)
    kx_, kw_, kaw_, kab_ = jax.random.split(key, 4)
    fan_in = n * k * k
    x = jax.random.normal(kx_, (b, n, H, W), dtype=jnp.float32)
    weight = jax.random.normal(kw_, (o_f, n, k, k), dtype=jnp.float32) / jnp.sqrt(fan_in)
    att_weight = jax.random.normal(kaw_, (k * k, n, k, k), dtype=jnp.float32) / jnp.sqrt(fan_in)
    att_bias = 0.1 * jax.random.normal(kab_, (k * k,), dtype=jnp.float32)

    y = aconv_forward(x, weight, att_weight, att_bias,
                      kernel_size=k, stride=stride, padding=padding)
    y = jax.block_until_ready(y)
    assert y.shape == (b, o_f, H, W)

    # The kernel feeds bf16 operands to the MXU, so compare against an f32
    # reference evaluated on the same bf16-quantized inputs.
    xq = x.astype(jnp.bfloat16).astype(jnp.float32)
    wq = weight.astype(jnp.bfloat16).astype(jnp.float32)
    awq = att_weight.astype(jnp.bfloat16).astype(jnp.float32)
    y_ref = aconv_reference(xq, wq, awq, att_bias,
                            kernel_size=k, stride=stride, padding=padding)
    np.testing.assert_allclose(np.asarray(y), np.asarray(y_ref),
                               rtol=1e-2, atol=1e-2)
    print("KERNEL_OK")
</pallas_src>

<mosaic_0001>
module attributes {stable_mosaic.version = 11 : i64} {
  func.func @_aconv_kernel(%arg0: i32, %arg1: memref<1x4x640xbf16, #tpu.memory_space<vmem>>, %arg2: memref<36x36xbf16, #tpu.memory_space<vmem>>, %arg3: memref<36x1xf32, #tpu.memory_space<vmem>>, %arg4: memref<8x36xbf16, #tpu.memory_space<vmem>>, %arg5: memref<1x8x512xbf16, #tpu.memory_space<vmem>>, %arg6: memref<36x512xf32, #tpu.memory_space<vmem>>) attributes {dimension_semantics = [#tpu.dimension_semantics<parallel>], iteration_bounds = array<i64: 2>, scalar_prefetch = 0 : i64, scratch_operands = 1 : i64, tpu.core_type = #tpu.core_type<tc>, window_params = [{transform_indices = @transform_0, window_bounds = array<i64: 1, 4, 640>}, {pipeline_mode = #tpu.pipeline_mode<synchronous>, transform_indices = @transform_1, window_bounds = array<i64: 36, 36>}, {pipeline_mode = #tpu.pipeline_mode<synchronous>, transform_indices = @transform_2, window_bounds = array<i64: 36, 1>}, {pipeline_mode = #tpu.pipeline_mode<synchronous>, transform_indices = @transform_3, window_bounds = array<i64: 8, 36>}, {transform_indices = @transform_4, window_bounds = array<i64: 1, 8, 512>}]} {
    %c0 = arith.constant 0 : index
    %c0_0 = arith.constant 0 : index
    %c0_1 = arith.constant 0 : index
    %0 = vector.load %arg1[%c0, %c0_0, %c0_1] : memref<1x4x640xbf16, #tpu.memory_space<vmem>>, vector<1x4x640xbf16>
    %1 = vector.shape_cast %0 : vector<1x4x640xbf16> to vector<4x640xbf16>
    %2 = vector.extract_strided_slice %1 {offsets = [0, 0], sizes = [4, 512], strides = [1, 1]} : vector<4x640xbf16> to vector<4x512xbf16>
    %3 = arith.extf %2 : vector<4x512xbf16> to vector<4x512xf32>
    %c0_2 = arith.constant 0 : index
    %c0_3 = arith.constant 0 : index
    %4 = vector.load %arg6[%c0_2, %c0_3] : memref<36x512xf32, #tpu.memory_space<vmem>>, vector<4x512xf32>
    tpu.vector_store %arg6[%c0_2, %c0_3], %3 {strides = array<i32>} : memref<36x512xf32, #tpu.memory_space<vmem>>, vector<4x512xf32>,
    %5 = vector.extract_strided_slice %1 {offsets = [0, 1], sizes = [4, 512], strides = [1, 1]} : vector<4x640xbf16> to vector<4x512xbf16>
    %6 = arith.extf %5 : vector<4x512xbf16> to vector<4x512xf32>
    %c4 = arith.constant 4 : index
    %c0_4 = arith.constant 0 : index
    %7 = vector.load %arg6[%c4, %c0_4] : memref<36x512xf32, #tpu.memory_space<vmem>>, vector<4x512xf32>
    tpu.vector_store %arg6[%c4, %c0_4], %6 {strides = array<i32>} : memref<36x512xf32, #tpu.memory_space<vmem>>, vector<4x512xf32>,
    %8 = vector.extract_strided_slice %1 {offsets = [0, 2], sizes = [4, 512], strides = [1, 1]} : vector<4x640xbf16> to vector<4x512xbf16>
    %9 = arith.extf %8 : vector<4x512xbf16> to vector<4x512xf32>
    %c8 = arith.constant 8 : index
    %c0_5 = arith.constant 0 : index
    %10 = vector.load %arg6[%c8, %c0_5] : memref<36x512xf32, #tpu.memory_space<vmem>>, vector<4x512xf32>
    tpu.vector_store %arg6[%c8, %c0_5], %9 {strides = array<i32>} : memref<36x512xf32, #tpu.memory_space<vmem>>, vector<4x512xf32>,
    %11 = vector.extract_strided_slice %1 {offsets = [0, 18], sizes = [4, 512], strides = [1, 1]} : vector<4x640xbf16> to vector<4x512xbf16>
    %12 = arith.extf %11 : vector<4x512xbf16> to vector<4x512xf32>
    %c12 = arith.constant 12 : index
    %c0_6 = arith.constant 0 : index
    %13 = vector.load %arg6[%c12, %c0_6] : memref<36x512xf32, #tpu.memory_space<vmem>>, vector<4x512xf32>
    tpu.vector_store %arg6[%c12, %c0_6], %12 {strides = array<i32>} : memref<36x512xf32, #tpu.memory_space<vmem>>, vector<4x512xf32>,
    %14 = vector.extract_strided_slice %1 {offsets = [0, 19], sizes = [4, 512], strides = [1, 1]} : vector<4x640xbf16> to vector<4x512xbf16>
    %15 = arith.extf %14 : vector<4x512xbf16> to vector<4x512xf32>
    %c16 = arith.constant 16 : index
    %c0_7 = arith.constant 0 : index
    %16 = vector.load %arg6[%c16, %c0_7] : memref<36x512xf32, #tpu.memory_space<vmem>>, vector<4x512xf32>
    tpu.vector_store %arg6[%c16, %c0_7], %15 {strides = array<i32>} : memref<36x512xf32, #tpu.memory_space<vmem>>, vector<4x512xf32>,
    %17 = vector.extract_strided_slice %1 {offsets = [0, 20], sizes = [4, 512], strides = [1, 1]} : vector<4x640xbf16> to vector<4x512xbf16>
    %18 = arith.extf %17 : vector<4x512xbf16> to vector<4x512xf32>
    %c20 = arith.constant 20 : index
    %c0_8 = arith.constant 0 : index
    %19 = vector.load %arg6[%c20, %c0_8] : memref<36x512xf32, #tpu.memory_space<vmem>>, vector<4x512xf32>
    tpu.vector_store %arg6[%c20, %c0_8], %18 {strides = array<i32>} : memref<36x512xf32, #tpu.memory_space<vmem>>, vector<4x512xf32>,
    %20 = vector.extract_strided_slice %1 {offsets = [0, 36], sizes = [4, 512], strides = [1, 1]} : vector<4x640xbf16> to vector<4x512xbf16>
    %21 = arith.extf %20 : vector<4x512xbf16> to vector<4x512xf32>
    %c24 = arith.constant 24 : index
    %c0_9 = arith.constant 0 : index
    %22 = vector.load %arg6[%c24, %c0_9] : memref<36x512xf32, #tpu.memory_space<vmem>>, vector<4x512xf32>
    tpu.vector_store %arg6[%c24, %c0_9], %21 {strides = array<i32>} : memref<36x512xf32, #tpu.memory_space<vmem>>, vector<4x512xf32>,
    %23 = vector.extract_strided_slice %1 {offsets = [0, 37], sizes = [4, 512], strides = [1, 1]} : vector<4x640xbf16> to vector<4x512xbf16>
    %24 = arith.extf %23 : vector<4x512xbf16> to vector<4x512xf32>
    %c28 = arith.constant 28 : index
    %c0_10 = arith.constant 0 : index
    %25 = vector.load %arg6[%c28, %c0_10] : memref<36x512xf32, #tpu.memory_space<vmem>>, vector<4x512xf32>
    tpu.vector_store %arg6[%c28, %c0_10], %24 {strides = array<i32>} : memref<36x512xf32, #tpu.memory_space<vmem>>, vector<4x512xf32>,
    %26 = vector.extract_strided_slice %1 {offsets = [0, 38], sizes = [4, 512], strides = [1, 1]} : vector<4x640xbf16> to vector<4x512xbf16>
    %27 = arith.extf %26 : vector<4x512xbf16> to vector<4x512xf32>
    %c32 = arith.constant 32 : index
    %c0_11 = arith.constant 0 : index
    %28 = vector.load %arg6[%c32, %c0_11] : memref<36x512xf32, #tpu.memory_space<vmem>>, vector<4x512xf32>
    tpu.vector_store %arg6[%c32, %c0_11], %27 {strides = array<i32>} : memref<36x512xf32, #tpu.memory_space<vmem>>, vector<4x512xf32>,
    %c0_12 = arith.constant 0 : index
    %c0_13 = arith.constant 0 : index
    %29 = vector.load %arg6[%c0_12, %c0_13] : memref<36x512xf32, #tpu.memory_space<vmem>>, vector<36x512xf32>
    %30 = arith.truncf %29 : vector<36x512xf32> to vector<36x512xbf16>
    %c0_14 = arith.constant 0 : index
    %c0_15 = arith.constant 0 : index
    %31 = vector.load %arg2[%c0_14, %c0_15] : memref<36x36xbf16, #tpu.memory_space<vmem>>, vector<36x36xbf16>
    %cst = arith.constant dense<0.000000e+00> : vector<36x512xf32>
    %32 = tpu.matmul %31, %30, %cst {dimension_numbers = #tpu.dot_dimension_numbers<[1], [0], [0], [1], [0, 0, 1, 1], [], []>} : vector<36x36xbf16>, vector<36x512xbf16>, vector<36x512xf32> -> vector<36x512xf32>
    %c0_16 = arith.constant 0 : index
    %c0_17 = arith.constant 0 : index
    %33 = vector.load %arg3[%c0_16, %c0_17] : memref<36x1xf32, #tpu.memory_space<vmem>>, vector<36x1xf32>
    %34 = vector.broadcast %33 : vector<36x1xf32> to vector<36x512xf32>
    %35 = arith.addf %32, %34 : vector<36x512xf32>
    %cst_18 = arith.constant dense<0xFF800000> : vector<512xf32>
    %36 = vector.multi_reduction <maximumf>, %35, %cst_18 [0] : vector<36x512xf32> to vector<512xf32>
    %37 = vector.shape_cast %36 : vector<512xf32> to vector<1x512xf32>
    %38 = vector.broadcast %37 : vector<1x512xf32> to vector<36x512xf32>
    %39 = arith.subf %35, %38 : vector<36x512xf32>
    %40 = math.exp %39 : vector<36x512xf32>
    %cst_19 = arith.constant dense<0.000000e+00> : vector<512xf32>
    %41 = vector.multi_reduction <add>, %40, %cst_19 [0] : vector<36x512xf32> to vector<512xf32>
    %42 = vector.shape_cast %41 : vector<512xf32> to vector<1x512xf32>
    %cst_20 = arith.constant 2.500000e-01 : f32
    %43 = vector.broadcast %cst_20 : f32 to vector<1x512xf32>
    %44 = arith.mulf %42, %43 : vector<1x512xf32>
    %45 = tpu.reciprocal %44 {approx = true} : vector<1x512xf32> -> vector<1x512xf32>
    %46 = vector.broadcast %45 : vector<1x512xf32> to vector<36x512xf32>
    %47 = arith.mulf %40, %46 : vector<36x512xf32>
    %48 = arith.mulf %29, %47 : vector<36x512xf32>
    %49 = arith.truncf %48 : vector<36x512xf32> to vector<36x512xbf16>
    %c0_21 = arith.constant 0 : index
    %c0_22 = arith.constant 0 : index
    %50 = vector.load %arg4[%c0_21, %c0_22] : memref<8x36xbf16, #tpu.memory_space<vmem>>, vector<8x36xbf16>
    %cst_23 = arith.constant dense<0.000000e+00> : vector<8x512xf32>
    %51 = tpu.matmul %50, %49, %cst_23 {dimension_numbers = #tpu.dot_dimension_numbers<[1], [0], [0], [1], [0, 0, 1, 1], [], []>} : vector<8x36xbf16>, vector<36x512xbf16>, vector<8x512xf32> -> vector<8x512xf32>
    %52 = arith.truncf %51 : vector<8x512xf32> to vector<8x512xbf16>
    %c0_24 = arith.constant 0 : index
    %c0_25 = arith.constant 0 : index
    %c0_26 = arith.constant 0 : index
    %53 = vector.load %arg5[%c0_24, %c0_25, %c0_26] : memref<1x8x512xbf16, #tpu.memory_space<vmem>>, vector<1x8x512xbf16>
    %54 = vector.shape_cast %53 : vector<1x8x512xbf16> to vector<8x512xbf16>
    %55 = vector.shape_cast %52 : vector<8x512xbf16> to vector<1x8x512xbf16>
    tpu.vector_store %arg5[%c0_24, %c0_25, %c0_26], %55 {strides = array<i32>} : memref<1x8x512xbf16, #tpu.memory_space<vmem>>, vector<1x8x512xbf16>,
    return
  }
  func.func @transform_0(%arg0: i32) -> (i32, i32, i32) {
    %c0_i32 = arith.constant 0 : i32
    %c0_i32_0 = arith.constant 0 : i32
    %c0_i32_1 = arith.constant 0 : i32
    return %arg0, %c0_i32, %c0_i32_0 : i32, i32, i32
  }
  func.func @transform_1(%arg0: i32) -> (i32, i32) {
    %c0_i32 = arith.constant 0 : i32
    %c0_i32_0 = arith.constant 0 : i32
    %c0_i32_1 = arith.constant 0 : i32
    return %c0_i32, %c0_i32_0 : i32, i32
  }
  func.func @transform_2(%arg0: i32) -> (i32, i32) {
    %c0_i32 = arith.constant 0 : i32
    %c0_i32_0 = arith.constant 0 : i32
    %c0_i32_1 = arith.constant 0 : i32
    return %c0_i32, %c0_i32_0 : i32, i32
  }
  func.func @transform_3(%arg0: i32) -> (i32, i32) {
    %c0_i32 = arith.constant 0 : i32
    %c0_i32_0 = arith.constant 0 : i32
    %c0_i32_1 = arith.constant 0 : i32
    return %c0_i32, %c0_i32_0 : i32, i32
  }
  func.func @transform_4(%arg0: i32) -> (i32, i32, i32) {
    %c0_i32 = arith.constant 0 : i32
    %c0_i32_0 = arith.constant 0 : i32
    %c0_i32_1 = arith.constant 0 : i32
    return %arg0, %c0_i32, %c0_i32_0 : i32, i32, i32
  }
}

</mosaic_0001>

<bundles_post_ra>
// kernel: aconv_forward.1
= control target key start
LH: loop header
LB: loop body
LE: loop exit
PB: predicated region body
PF: predicated region fallthrough
CT: control target
= control target key end

     0   :  { %s1230_s15 = smov 0   ;;  %s1596_s0 = inlined_call_operand.vmem [shape: bf16[2,4,640], index: 0, kind: input, shape index: {}]   ;;  %s1597_s1 = inlined_call_operand.vmem [shape: bf16[36,36], index: 1, kind: input, shape index: {}]   ;;  %s1598_s2 = inlined_call_operand.vmem [shape: f32[36,1], index: 2, kind: input, shape index: {}]   ;;  %s1599_s3 = inlined_call_operand.vmem [shape: bf16[8,36], index: 3, kind: input, shape index: {}]   ;;  %s1600_s4 = inlined_call_operand.vmem [shape: bf16[2,8,512], index: 4, kind: output, shape index: {}]  }
   0x1 LB: > { %s1007_s16 = sadd.s32 4294967295, %s1194_s15   ;;  %p1011_p0 = scmp.ge.s32.totalorder %s1194_s15, 1  ;;  %s1194_s15 = sphi %s1230_s15, %s14_s15  }
   0x2   : > { %p162_p1 = scmp.lt.s32.totalorder %s1194_s15, 3 }
   0x4   : > { %p163_p2 = pnand %p1011_p0, %p162_p1 }
   0x6   : > { %166 = sbr.rel (%p163_p2) target bundleno = 745 (0x2e9), region = 36 }
   0xd   : > { %p188_p3 = scmp.lt.s32.totalorder %s1007_s16, 1  ;;  %s1196_s21 = smov 126   ;;  %v1204_v16 = vmov 0   ;;  %v439_v17 = vld [vmem:[%s1598_s2] sm:$0xff]  ;;  %v440_v18 = vld [vmem:[%s1598_s2 + $0x8] sm:$0xff]  ;;  %v441_v19 = vld [vmem:[%s1598_s2 + $0x10] sm:$0xff] }
   0xe   : > { %s1197_s22 = smov 127   ;;  %s1198_s23 = smov 110   ;;  %537 = vmatprep.mubr.bf16.mxu0 %v1204_v16  ;;  %598 = vmatprep.mubr.bf16.mxu1 %v1204_v16  ;;  %v442_v20 = vld [vmem:[%s1598_s2 + $0x18] sm:$0xff]  ;;  %v443_v21 = vld [vmem:[%s1598_s2 + $0x20] sm:$0xf]  ;;  %vm251_vm0 = vcmask 1031168  }
   0xf   : > { %s1611_s16 = smov (!%p188_p3, %s1007_s16), 1  ;;  %s1199_s24 = smov 109   ;;  %1135 = vset.pattern.permute.xlu0 %v1204_v16  ;;  %1136 = vset.pattern.permute.xlu1 %v1204_v16  ;;  %vm228_vm1 = vcmask 1039360   ;;  %vm274_vm2 = vcmask 900096   ;;  %vm297_vm3 = vcmask 891904   ;;  %vm320_vm4 = vcmask 883712  }
  0x10   : > { %s1037_s17 = smul.u32 10, %s1611_s16  ;;  %s1200_s25 = smov 108   ;;  %vm343_vm5 = vcmask 752640   ;;  %vm366_vm6 = vcmask 744448   ;;  %vm389_vm7 = vcmask 736256   ;;  %vm492_vm8 = vcmask 1041408  }
  0x11   : > { %s1201_s26 = smov 92   ;;  %s1202_s27 = smov 91   ;;  %vm482_vm9 = vcmask 293888   ;;  %vm630_vm10 = vcmask 1043456  }
  0x12   : > { %s192_s20 = scalar_lea.vmem %s1596_s0, %s1037_s17  ;;  %s1203_s28 = smov 90  }
  0x13   : > { %v199_v0 = vld [vmem:[%s192_s20] sm:$0xff]  ;;  %v200_v1 = vld [vmem:[%s192_s20 + $0x8] sm:$0x3] }
  0x14   : > { %v201_v2 = vunpack.c.l.bf16 %v199_v0  ;;  %v202_v3 = vunpack.c.h.bf16 %v199_v0  ;;  %v213_v4 = vunpack.c.l.bf16 %v200_v1 }
  0x16   : > { %241 = vrot.lane.b32.xlu1 %v201_v2, %s1196_s21  ;;  %209 = vst [vmem:[#allocation2] sm:$0xf] %v201_v2  ;;  %211 = vst [vmem:[#allocation2 + $0x10] sm:$0xf] %v202_v3  ;;  %v216_v5 = vcombine.low %v202_v3, %v202_v3  ;;  %v205_v6 = vcombine.high %v201_v2, %v201_v2  ;;  %v217_v7 = vcombine.low %v213_v4, %v213_v4 }
  0x17   : > { %v206_v8 = vcombine.high %v202_v3, %v202_v3  ;;  %v215_v13 = vcombine.low %v201_v2, %v201_v2 }
  0x18   : > { %v1055_v9 = vpack.i.bf16 %v216_v5, %v201_v2  ;;  %v1065_v10 = vpack.i.bf16 %v202_v3, %v205_v6  ;;  %210 = vst [vmem:[#allocation2 + $0x8] sm:$0xf] %v205_v6  ;;  %v1060_v11 = vpack.i.bf16 %v217_v7, %v202_v3  ;;  %v1125_v14 = vpack.i.bf16 %v205_v6, %v201_v2 }
  0x19   : > { %212 = vst [vmem:[#allocation2 + $0x18] sm:$0xf] %v206_v8  ;;  %v1070_v12 = vpack.i.bf16 %v213_v4, %v206_v8  ;;  %v1130_v15 = vpack.i.bf16 %v206_v8, %v202_v3 }
  0x1a   : > { %1056 = vrot.lane.b32.xlu0 %v1055_v9, %s1197_s22  ;;  %1066 = vrot.lane.b32.xlu1 %v1065_v10, %s1196_s21 }
  0x1e   : > { %1061 = vrot.lane.b32.xlu0 %v1060_v11, %s1197_s22  ;;  %1071 = vrot.lane.b32.xlu1 %v1070_v12, %s1196_s21 }
  0x22   : > { %1076 = vrot.lane.b32.xlu0 %v1055_v9, %s1198_s23  ;;  %1081 = vrot.lane.b32.xlu1 %v1060_v11, %s1198_s23 }
  0x26   : > { %218 = vrot.lane.b32.xlu0 %v215_v13, %s1197_s22  ;;  %1086 = vrot.lane.b32.xlu1 %v1065_v10, %s1199_s24 }
  0x2a   : > { %264 = vrot.lane.b32.xlu0 %v215_v13, %s1198_s23  ;;  %1096 = vrot.lane.b32.xlu1 %v1055_v9, %s1200_s25  ;;  %s1034_s23 = sshll.u32 %s1611_s16, 4 }
  0x2e   : > { %1091 = vrot.lane.b32.xlu0 %v1070_v12, %s1199_s24  ;;  %1106 = vrot.lane.b32.xlu1 %v1065_v10, %s1201_s26 }
  0x32   : > { %1101 = vrot.lane.b32.xlu0 %v1060_v11, %s1200_s25  ;;  %1116 = vrot.lane.b32.xlu1 %v1055_v9, %s1202_s27 }
  0x36   : > { %1111 = vrot.lane.b32.xlu0 %v1070_v12, %s1201_s26  ;;  %287 = vrot.lane.b32.xlu1 %v201_v2, %s1199_s24 }
  0x3a   : > { %1121 = vrot.lane.b32.xlu0 %v1060_v11, %s1202_s27  ;;  %333 = vrot.lane.b32.xlu1 %v201_v2, %s1201_s26  ;;  %s197_s26 = scalar_lea.vmem %s1600_s4, %s1034_s23 }
  0x3e   : > { %310 = vrot.lane.b32.xlu0 %v215_v13, %s1200_s25  ;;  %1126 = vrot.lane.b32.xlu1 %v1125_v14, %s1203_s28 }
  0x42   : > { %356 = vrot.lane.b32.xlu0 %v215_v13, %s1202_s27  ;;  %387 = vrot.lane.b32.xlu1 %v213_v4, %s1203_s28 }
  0x46   : > { %1131 = vrot.lane.b32.xlu0 %v1130_v15, %s1203_s28  ;;  %451 = vperm.xlu1 %1136, %v440_v18  }
  0x4a   : > { %446 = vperm.xlu0 %1135, %v439_v17   ;;  %456 = vperm.xlu1 %1136, %v441_v19  }
  0x4e   : > { %461 = vperm.xlu0 %1135, %v442_v20   ;;  %466 = vperm.xlu1 %1136, %v443_v21  }
  0x88   : > { %v242_v22 = vpop.permute.xlu1 %241 }
  0x8c   : > { %v1057_v23 = vpop.permute.xlu0 %1056  ;;  %v1067_v24 = vpop.permute.xlu1 %1066 }
  0x8d   : > { %v1059_v25 = vunpack.i.h.bf16 %v1057_v23  ;;  %v1058_v26 = vunpack.i.l.bf16 %v1057_v23  ;;  %v1069_v27 = vunpack.i.h.bf16 %v1067_v24  ;;  %v1068_v28 = vunpack.i.l.bf16 %v1067_v24 }
  0x8f   : > { %v252_v29 = vsel %vm251_vm0, %v242_v22, %v1068_v28  ;;  %v253_v30 = vsel %vm251_vm0, %v1068_v28, %v1069_v27  ;;  %v230_v31 = vsel %vm228_vm1, %v1058_v26, %v1059_v25 }
  0x90   : > { %260 = vst [vmem:[#allocation2 + $0x20] sm:$0xf] %v252_v29  ;;  %261 = vst [vmem:[#allocation2 + $0x28] sm:$0xf] %v253_v30  ;;  %v1062_v32 = vpop.permute.xlu0 %1061  ;;  %v1072_v33 = vpop.permute.xlu1 %1071 }
  0x91   : > { %238 = vst [vmem:[#allocation2 + $0x8] sm:$0xf0] %v230_v31  ;;  %v1064_v34 = vunpack.i.h.bf16 %v1062_v32  ;;  %v1063_v35 = vunpack.i.l.bf16 %v1062_v32  ;;  %v1074_v36 = vunpack.i.h.bf16 %v1072_v33  ;;  %v1073_v37 = vunpack.i.l.bf16 %v1072_v33 }
  0x93   : > { %v254_v38 = vsel %vm251_vm0, %v1069_v27, %v1073_v37  ;;  %v255_v39 = vsel %vm251_vm0, %v1073_v37, %v1074_v36  ;;  %v231_v40 = vsel %vm228_vm1, %v1059_v25, %v1063_v35  ;;  %v232_v41 = vsel %vm228_vm1, %v1063_v35, %v1064_v34 }
  0x94   : > { %262 = vst [vmem:[#allocation2 + $0x30] sm:$0xf] %v254_v38  ;;  %263 = vst [vmem:[#allocation2 + $0x38] sm:$0xf] %v255_v39  ;;  %v1077_v42 = vpop.permute.xlu0 %1076  ;;  %v1082_v43 = vpop.permute.xlu1 %1081 }
  0x95   : > { %239 = vst [vmem:[#allocation2 + $0x10] sm:$0xf0] %v231_v40  ;;  %240 = vst [vmem:[#allocation2 + $0x18] sm:$0xf0] %v232_v41  ;;  %v1079_v44 = vunpack.i.h.bf16 %v1077_v42  ;;  %v1078_v45 = vunpack.i.l.bf16 %v1077_v42  ;;  %v1084_v46 = vunpack.i.h.bf16 %v1082_v43  ;;  %v1083_v47 = vunpack.i.l.bf16 %v1082_v43 }
  0x97   : > { %v276_v48 = vsel %vm274_vm2, %v1078_v45, %v1079_v44  ;;  %v277_v49 = vsel %vm274_vm2, %v1079_v44, %v1083_v47  ;;  %v278_v50 = vsel %vm274_vm2, %v1083_v47, %v1084_v46 }
  0x98   : > { %v219_v51 = vpop.permute.xlu0 %218  ;;  %v1273_v52 = vpop.permute.xlu1 %1086  ;;  %284 = vst [vmem:[#allocation2 + $0x28] sm:$0xf0] %v276_v48  ;;  %285 = vst [vmem:[#allocation2 + $0x30] sm:$0xf0] %v277_v49  ;;  %v1284_v62 = vld [vmem:[#allocation2 + $0x8] sm:$0xff] }
  0x99   : > { %286 = vst [vmem:[#allocation2 + $0x38] sm:$0xf0] %v278_v50  ;;  %v229_v53 = vsel %vm228_vm1, %v219_v51, %v1058_v26  ;;  %v1089_v54 = vunpack.i.h.bf16 %v1273_v52  ;;  %v1088_v55 = vunpack.i.l.bf16 %v1273_v52 }
  0x9a   : > { %237 = vst [vmem:[#allocation2] sm:$0xf0] %v229_v53 }
  0x9b   : > { %v299_v56 = vsel %vm297_vm3, %v1088_v55, %v1089_v54 }
  0x9c   : > { %v265_v57 = vpop.permute.xlu0 %264  ;;  %v1279_v58 = vpop.permute.xlu1 %1096  ;;  %307 = vst [vmem:[#allocation2 + $0x48] sm:$0xf] %v299_v56  ;;  %v1286_v63 = vld [vmem:[#allocation2 + $0x18] sm:$0xff]  ;;  %v1288_v0 = vld [vmem:[#allocation2 + $0x10] sm:$0xff] }
  0x9d   : > { %v275_v59 = vsel %vm274_vm2, %v265_v57, %v1078_v45  ;;  %v1099_v60 = vunpack.i.h.bf16 %v1279_v58  ;;  %v1098_v61 = vunpack.i.l.bf16 %v1279_v58 }
  0x9e   : > { %283 = vst [vmem:[#allocation2 + $0x20] sm:$0xf0] %v275_v59 }
  0x9f   : > { %v1290_v1 = vld [vmem:[#allocation2 + $0x28] sm:$0xff]  ;;  %v1294_v3 = vld [vmem:[#allocation2 + $0x30] sm:$0xff]  ;;  %v322_v4 = vsel %vm320_vm4, %v1098_v61, %v1099_v60 }
  0xa0   : > { %v1292_v2 = vld [vmem:[#allocation2 + $0x38] sm:$0xff]  ;;  %v1092_v5 = vpop.permute.xlu0 %1091  ;;  %v1107_v6 = vpop.permute.xlu1 %1106  ;;  %v423_v7 = vpack.c.bf16 %v1290_v1, %v1284_v62  ;;  %v424_v9 = vpack.c.bf16 %v1294_v3, %v1288_v0  ;;  %330 = vst [vmem:[#allocation2 + $0x48] sm:$0xf0] %v322_v4 }
  0xa1   : > { %v425_v8 = vpack.c.bf16 %v1292_v2, %v1286_v63  ;;  %v1094_v10 = vunpack.i.h.bf16 %v1092_v5  ;;  %v1093_v11 = vunpack.i.l.bf16 %v1092_v5  ;;  %v1109_v12 = vunpack.i.h.bf16 %v1107_v6  ;;  %v1308_v24 = vld [vmem:[#allocation2] sm:$0xff] }
  0xa2   : > { %v1108_v13 = vunpack.i.l.bf16 %v1107_v6  ;;  %505 = vmatprep.subr.bf16.mxu0 %v423_v7 }
  0xa3   : > { %566 = vmatprep.subr.bf16.mxu1 %v425_v8  ;;  %v301_v14 = vsel %vm297_vm3, %v1093_v11, %v1094_v10  ;;  %v300_v15 = vsel %vm297_vm3, %v1089_v54, %v1093_v11 }
  0xa4   : > { %567 = vmatpush1.bf16.msra.mxu1 %v424_v9  ;;  %v345_v17 = vsel %vm343_vm5, %v1108_v13, %v1109_v12  ;;  %v1102_v18 = vpop.permute.xlu0 %1101  ;;  %v1117_v19 = vpop.permute.xlu1 %1116  ;;  %309 = vst [vmem:[#allocation2 + $0x58] sm:$0xf] %v301_v14  ;;  %308 = vst [vmem:[#allocation2 + $0x50] sm:$0xf] %v300_v15 }
  0xa5   : > { %353 = vst [vmem:[#allocation2 + $0x68] sm:$0xf] %v345_v17  ;;  %v1104_v20 = vunpack.i.h.bf16 %v1102_v18  ;;  %v1103_v21 = vunpack.i.l.bf16 %v1102_v18  ;;  %v1119_v22 = vunpack.i.h.bf16 %v1117_v19  ;;  %v1118_v23 = vunpack.i.l.bf16 %v1117_v19  ;;  %v1310_v25 = vld [vmem:[#allocation2 + $0x20] sm:$0xff] }
  0xa6   : > { %v422_v26 = vpack.c.bf16 %v1310_v25, %v1308_v24 }
  0xa7   : > { %v368_v27 = vsel %vm366_vm6, %v1118_v23, %v1119_v22  ;;  %v323_v28 = vsel %vm320_vm4, %v1099_v60, %v1103_v21  ;;  %v324_v29 = vsel %vm320_vm4, %v1103_v21, %v1104_v20  ;;  %v1323_v44 = vld [vmem:[#allocation2 + $0x48] sm:$0xff] }
  0xa8   : > { %376 = vst [vmem:[#allocation2 + $0x68] sm:$0xf0] %v368_v27  ;;  %v1112_v30 = vpop.permute.xlu0 %1111  ;;  %v288_v31 = vpop.permute.xlu1 %287  ;;  %506 = vmatpush1.bf16.msra.mxu0 %v422_v26  ;;  %331 = vst [vmem:[#allocation2 + $0x50] sm:$0xf0] %v323_v28  ;;  %v1137_v26 = vld [vmem:[%s1597_s1] sm:$0xff]   ;;  %v1138_v27 = vld [vmem:[%s1597_s1 + $0x8] sm:$0xff]  }
  0xa9   : > { %332 = vst [vmem:[#allocation2 + $0x58] sm:$0xf0] %v324_v29  ;;  %v1114_v32 = vunpack.i.h.bf16 %v1112_v30  ;;  %v1113_v33 = vunpack.i.l.bf16 %v1112_v30  ;;  %v298_v34 = vsel %vm297_vm3, %v288_v31, %v1088_v55  ;;  %v1139_v28 = vld [vmem:[%s1597_s1 + $0x10] ss:$0 sps:$4 sm:$0x33]  }
  0xaa   : > { %306 = vst [vmem:[#allocation2 + $0x40] sm:$0xf] %v298_v34 }
  0xab   : > { %v347_v35 = vsel %vm343_vm5, %v1113_v33, %v1114_v32  ;;  %v346_v36 = vsel %vm343_vm5, %v1109_v12, %v1113_v33 }
  0xac   : > { %v1122_v37 = vpop.permute.xlu0 %1121  ;;  %355 = vst [vmem:[#allocation2 + $0x78] sm:$0xf] %v347_v35  ;;  %v334_v38 = vpop.permute.xlu1 %333  ;;  %354 = vst [vmem:[#allocation2 + $0x70] sm:$0xf] %v346_v36 }
  0xad   : > { %v1124_v39 = vunpack.i.h.bf16 %v1122_v37  ;;  %v1123_v40 = vunpack.i.l.bf16 %v1122_v37  ;;  %v344_v41 = vsel %vm343_vm5, %v334_v38, %v1108_v13 }
  0xae   : > { %352 = vst [vmem:[#allocation2 + $0x60] sm:$0xf] %v344_v41 }
  0xaf   : > { %v369_v42 = vsel %vm366_vm6, %v1119_v22, %v1123_v40  ;;  %v370_v43 = vsel %vm366_vm6, %v1123_v40, %v1124_v39  ;;  %v1325_v45 = vld [vmem:[#allocation2 + $0x68] sm:$0xff]  ;;  %v1338_v57 = vld [vmem:[#allocation2 + $0x50] sm:$0xff] }
  0xb0   : > { %377 = vst [vmem:[#allocation2 + $0x70] sm:$0xf0] %v369_v42  ;;  %378 = vst [vmem:[#allocation2 + $0x78] sm:$0xf0] %v370_v43  ;;  %v311_v46 = vpop.permute.xlu0 %310  ;;  %v427_v47 = vpack.c.bf16 %v1325_v45, %v1323_v44  ;;  %v1127_v48 = vpop.permute.xlu1 %1126  ;;  %v1334_v55 = vld [vmem:[#allocation2 + $0x58] sm:$0xff] }
  0xb1   : > { %v321_v49 = vsel %vm320_vm4, %v311_v46, %v1098_v61  ;;  %v1129_v50 = vunpack.i.h.bf16 %v1127_v48  ;;  %v1128_v51 = vunpack.i.l.bf16 %v1127_v48 }
  0xb2   : > { %329 = vst [vmem:[#allocation2 + $0x40] sm:$0xf0] %v321_v49  ;;  %507 = vmatprep.subr.bf16.mxu0 %v427_v47 }
  0xb3   : > { %v390_v52 = vsel %vm389_vm7, %v1128_v51, %v1129_v50 }
  0xb4   : > { %v357_v53 = vpop.permute.xlu0 %356  ;;  %398 = vst [vmem:[#allocation2 + $0x80] sm:$0xf] %v390_v52  ;;  %v388_v60 = vpop.permute.xlu1 %387 }
  0xb5   : > { %v367_v54 = vsel %vm366_vm6, %v357_v53, %v1118_v23 }
  0xb6   : > { %375 = vst [vmem:[#allocation2 + $0x60] sm:$0xf0] %v367_v54 }
  0xb7   : > { %v1336_v56 = vld [vmem:[#allocation2 + $0x78] sm:$0xff]  ;;  %v1340_v58 = vld [vmem:[#allocation2 + $0x70] sm:$0xff] }
  0xb8   : > { %1604 = vst [vmem:[#allocation3_spill] sm:$0xff] %v1336_v56  ;;  %v1132_v59 = vpop.permute.xlu0 %1131  ;;  %v429_v61 = vpack.c.bf16 %v1336_v56, %v1334_v55  ;;  %v428_v4 = vpack.c.bf16 %v1340_v58, %v1338_v57 }
  0xb9   : > { %v1134_v5 = vunpack.i.h.bf16 %v1132_v59  ;;  %v1133_v6 = vunpack.i.l.bf16 %v1132_v59  ;;  %v1349_v10 = vld [vmem:[#allocation2 + $0x40] sm:$0xff] }
  0xba   : > { %568 = vmatprep.subr.bf16.mxu1 %v429_v61 }
  0xbb   : > { %v392_v7 = vsel %vm389_vm7, %v1133_v6, %v1134_v5  ;;  %v391_v8 = vsel %vm389_vm7, %v1129_v50, %v1133_v6  ;;  %v393_v9 = vsel %vm389_vm7, %v1134_v5, %v388_v60  ;;  %569 = vmatpush1.bf16.msra.mxu1 %v428_v4  ;;  %v1355_v13 = vld [vmem:[#allocation2 + $0x80] sm:$0xf] }
  0xbc   : > { %400 = vst [vmem:[#allocation2 + $0x90] sm:$0xf] %v392_v7  ;;  %399 = vst [vmem:[#allocation2 + $0x88] sm:$0xf] %v391_v8  ;;  %v430_v14 = vpack.c.bf16 %v1355_v13, %v1355_v13 }
  0xbd   : > { %401 = vst [vmem:[#allocation2 + $0x98] sm:$0xf] %v393_v9  ;;  %v1351_v11 = vld [vmem:[#allocation2 + $0x60] sm:$0xff] }
  0xbe   : > { %v426_v12 = vpack.c.bf16 %v1351_v11, %v1349_v10  ;;  %v494_v22 = vsel %vm492_vm8, %v430_v14, 0 }
  0xc0   : > { %508 = vmatpush1.bf16.msra.mxu0 %v426_v12 }
  0xc3   : > { %v1359_v15 = vld [vmem:[#allocation2 + $0x88] sm:$0xf]  ;;  %v1363_v18 = vld [vmem:[#allocation2 + $0x90] sm:$0xf] }
  0xc4   : > { %v1361_v17 = vld [vmem:[#allocation2 + $0x98] sm:$0xf]  ;;  %1606 = vst [vmem:[#allocation5_spill] sm:$0xff] %v1363_v18  ;;  %v431_v19 = vpack.c.bf16 %v1359_v15, %v1359_v15  ;;  %v432_v21 = vpack.c.bf16 %v1363_v18, %v1363_v18 }
  0xc5   : > { %1605 = vst [vmem:[#allocation4_spill] sm:$0xff] %v1361_v17  ;;  %v433_v20 = vpack.c.bf16 %v1361_v17, %v1361_v17  ;;  %v452_v30 = vpop.permute.xlu1 %451 }
  0xc6   : > { %1018 = vmatprep.subr.msk.bf16.mxu0 %vm492_vm8, %v431_v19  ;;  %v500_v23 = vsel %vm492_vm8, %v432_v21, 0 }
  0xc7   : > { %1022 = vmatprep.subr.msk.bf16.mxu1 %vm492_vm8, %v433_v20  ;;  %510 = vmatpush1.bf16.msra.mxu0 %v494_v22 }
  0xc8   : > { %571 = vmatpush1.bf16.msra.mxu1 %v500_v23 }
  0xc9   : > { %v447_v29 = vpop.permute.xlu0 %446  ;;  %v457_v52 = vpop.permute.xlu1 %456 }
  0xca   : > { %1019 = vmatmul.mubr.msk.bf16.vlgmr.msra.gmra.mrb[0].mxu0 %vm482_vm9, %v1137_v26 }
  0xcb   : > { %1023 = vmatmul.mubr.msk.bf16.vlgmr.msra.gmra.mrb[0].mxu1 %vm482_vm9, %v1137_v26  ;;  %547 = vmatprep.mubr.bf16.mxu0 %v1204_v16 }
  0xcc   : > { %608 = vmatprep.mubr.bf16.mxu1 %v1204_v16 }
  0xcd   : > { %v462_v53 = vpop.permute.xlu0 %461 }
  0xd2   : > { %1020 = vmatmul.mubr.msk.bf16.gmra.mrb[4].mxu0 %vm482_vm9, %v1138_v27 }
  0xd3   : > { %1024 = vmatmul.mubr.msk.bf16.gmra.mrb[4].mxu1 %vm482_vm9, %v1138_v27  ;;  %557 = vmatprep.mubr.bf16.mxu0 %v1204_v16 }
  0xd4   : > { %618 = vmatprep.mubr.bf16.mxu1 %v1204_v16 }
  0xda   : > { %1021 = vmatmul.mubr.msk.bf16.gmra.mrb[8].mxu0 %vm482_vm9, %v1139_v28 }
  0xdb   : > { %1025 = vmatmul.mubr.msk.bf16.gmra.mrb[8].mxu1 %vm482_vm9, %v1139_v28  ;;  %884 = vmatprep.mubr.bf16.mxu0 %v1204_v16 }
  0xdc   : > { %925 = vmatprep.mubr.bf16.mxu1 %v1204_v16 }
 0x19d   : > { %v539_v31 = vpop.f32.mrb[0].mxu0 }
 0x19e   : > { %v600_v32 = vpop.f32.mrb[0].mxu1  ;;  %v541_v33 = vpop.f32.mrb[1].mxu0  ;;  %v1396_v37 = vadd.f32 %v539_v31, %v447_v29 }
 0x19f   : > { %v602_v34 = vpop.f32.mrb[1].mxu1  ;;  %v543_v35 = vpop.f32.mrb[2].mxu0  ;;  %v1398_v38 = vadd.f32 %v600_v32, %v447_v29  ;;  %v1404_v43 = vadd.f32 %v541_v33, %v447_v29 }
 0x1a0   : > { %v604_v36 = vpop.f32.mrb[2].mxu1  ;;  %v1400_v39 = vadd.f32 %v543_v35, %v452_v30  ;;  %v545_v41 = vpop.f32.mrb[3].mxu0  ;;  %v1406_v16 = vadd.f32 %v602_v34, %v447_v29 }
 0x1a1   : > { %v1402_v40 = vadd.f32 %v604_v36, %v452_v30  ;;  %v606_v42 = vpop.f32.mrb[3].mxu1  ;;  %v1408_v46 = vadd.f32 %v545_v41, %v452_v30  ;;  %v467_v33 = vpop.permute.xlu1 %466 }
 0x1a2   : > { %v1410_v47 = vadd.f32 %v606_v42, %v452_v30  ;;  %v627_v48 = vmax.f32 %v1396_v37, %v1400_v39 }
 0x1a3   : > { %v650_v49 = vmax.f32 %v1398_v38, %v1402_v40  ;;  %v639_v50 = vmax.f32 %v1404_v43, %v1408_v46 }
 0x1a4   : > { %v661_v51 = vmax.f32 %v1406_v16, %v1410_v47 }
 0x1a5   : > { %v549_v54 = vpop.f32.mrb[4].mxu0 }
 0x1a6   : > { %v610_v59 = vpop.f32.mrb[4].mxu1  ;;  %v1420_v60 = vadd.f32 %v549_v54, %v457_v52  ;;  %v551_v4 = vpop.f32.mrb[5].mxu0 }
 0x1a7   : > { %v1422_v61 = vadd.f32 %v610_v59, %v457_v52  ;;  %v612_v5 = vpop.f32.mrb[5].mxu1  ;;  %v1424_v6 = vadd.f32 %v551_v4, %v457_v52  ;;  %v553_v8 = vpop.f32.mrb[6].mxu0 }
 0x1a8   : > { %v1426_v7 = vadd.f32 %v612_v5, %v457_v52  ;;  %v614_v9 = vpop.f32.mrb[6].mxu1  ;;  %v628_v12 = vmax.f32 %v627_v48, %v1420_v60  ;;  %v1430_v19 = vadd.f32 %v553_v8, %v462_v53  ;;  %v555_v21 = vpop.f32.mrb[7].mxu0 }
 0x1a9   : > { %v651_v14 = vmax.f32 %v650_v49, %v1422_v61  ;;  %v1432_v20 = vadd.f32 %v614_v9, %v462_v53  ;;  %v616_v22 = vpop.f32.mrb[7].mxu1  ;;  %v640_v23 = vmax.f32 %v639_v50, %v1424_v6  ;;  %v1436_v27 = vadd.f32 %v555_v21, %v462_v53 }
 0x1aa   : > { %v662_v26 = vmax.f32 %v661_v51, %v1426_v7  ;;  %v1438_v28 = vadd.f32 %v616_v22, %v462_v53  ;;  %v629_v29 = vmax.f32 %v628_v12, %v1430_v19 }
 0x1ab   : > { %v652_v30 = vmax.f32 %v651_v14, %v1432_v20  ;;  %v641_v31 = vmax.f32 %v640_v23, %v1436_v27 }
 0x1ac   : > { %v663_v32 = vmax.f32 %v662_v26, %v1438_v28 }
 0x1ad   : > { %v559_v34 = vpop.f32.mrb[8].mxu0 }
 0x1ae   : > { %v620_v35 = vpop.f32.mrb[8].mxu1  ;;  %v560_v36 = vadd.f32 %v559_v34, %v467_v33  ;;  %v561_v42 = vpop.f32.mrb[9].mxu0 }
 0x1af   : > { %v1444_v41 = vadd.f32 %v620_v35, %v467_v33  ;;  %v622_v48 = vpop.f32.mrb[9].mxu1  ;;  %v1446_v49 = vadd.f32 %v561_v42, %v467_v33  ;;  %v563_v51 = vpop.f32.mrb[10].mxu0 }
 0x1b0   : > { %v1448_v50 = vadd.f32 %v622_v48, %v467_v33  ;;  %v624_v52 = vpop.f32.mrb[10].mxu1  ;;  %v631_v53 = vsel %vm630_vm10, %v560_v36, -inf  ;;  %v564_v59 = vpop.f32.mrb[11].mxu0 }
 0x1b1   : > { %v653_v54 = vsel %vm630_vm10, %v1444_v41, -inf  ;;  %v625_v4 = vpop.f32.mrb[11].mxu1  ;;  %v632_v5 = vmax.f32 %v629_v29, %v631_v53  ;;  %v642_v9 = vsel %vm630_vm10, %v1446_v49, -inf }
 0x1b2   : > { %v654_v8 = vmax.f32 %v652_v30, %v653_v54  ;;  %v664_v12 = vsel %vm630_vm10, %v1448_v50, -inf  ;;  %v643_v14 = vmax.f32 %v641_v31, %v642_v9 }
 0x1b3   : > { %v665_v21 = vmax.f32 %v663_v32, %v664_v12  ;;  %v633_v22 = vrot.slane %v632_v5, 4 }
 0x1b4   : > { %v655_v23 = vrot.slane %v654_v8, 4  ;;  %v644_v26 = vrot.slane %v643_v14, 4 }
 0x1b5   : > { %v666_v33 = vrot.slane %v665_v21, 4  ;;  %v634_v34 = vmax.f32 %v632_v5, %v633_v22 }
 0x1b6   : > { %v656_v35 = vmax.f32 %v654_v8, %v655_v23  ;;  %v645_v42 = vmax.f32 %v643_v14, %v644_v26 }
 0x1b7   : > { %v667_v48 = vmax.f32 %v665_v21, %v666_v33  ;;  %v635_v51 = vrot.slane %v634_v34, 2 }
 0x1b8   : > { %v657_v52 = vrot.slane %v656_v35, 2  ;;  %v646_v29 = vrot.slane %v645_v42, 2 }
 0x1b9   : > { %v668_v30 = vrot.slane %v667_v48, 2  ;;  %v636_v53 = vmax.f32 %v634_v34, %v635_v51 }
 0x1ba   : > { %v658_v54 = vmax.f32 %v656_v35, %v657_v52  ;;  %v647_v59 = vmax.f32 %v645_v42, %v646_v29 }
 0x1bb   : > { %v669_v4 = vmax.f32 %v667_v48, %v668_v30  ;;  %v637_v18 = vrot.slane %v636_v53, 1 }
 0x1bc   : > { %v659_v17 = vrot.slane %v658_v54, 1  ;;  %v648_v31 = vrot.slane %v647_v59, 1 }
 0x1bd   : > { %v638_v32 = vmax.f32 %v636_v53, %v637_v18  ;;  %v670_v56 = vrot.slane %v669_v4, 1 }
 0x1be   : > { %v660_v9 = vmax.f32 %v658_v54, %v659_v17  ;;  %v649_v12 = vmax.f32 %v647_v59, %v648_v31 }
 0x1bf   : > { %v672_v5 = vsub.f32 %v1396_v37, %v638_v32  ;;  %v676_v8 = vsub.f32 %v1400_v39, %v638_v32  ;;  %v680_v14 = vsub.f32 %v1420_v60, %v638_v32  ;;  %v684_v21 = vsub.f32 %v1430_v19, %v638_v32 }
 0x1c0   : > { %v688_v22 = vsub.f32 %v560_v36, %v638_v32  ;;  %v674_v23 = vsub.f32 %v1398_v38, %v660_v9  ;;  %v678_v26 = vsub.f32 %v1402_v40, %v660_v9  ;;  %v682_v33 = vsub.f32 %v1422_v61, %v660_v9 }
 0x1c1   : > { %v692_v34 = vmul.f32 1.442695, %v672_v5  ;;  %v700_v18 = vmul.f32 1.442695, %v676_v8  ;;  %v708_v17 = vmul.f32 1.442695, %v680_v14  ;;  %v686_v35 = vsub.f32 %v1432_v20, %v660_v9 }
 0x1c2   : > { %v716_v42 = vmul.f32 1.442695, %v684_v21  ;;  %v690_v37 = vsub.f32 %v1444_v41, %v660_v9  ;;  %v671_v39 = vmax.f32 %v669_v4, %v670_v56  ;;  %v724_v60 = vmul.f32 1.442695, %v688_v22 }
 0x1c3   : > { %1140 = vpow2.f32 %v692_v34  ;;  %v696_v48 = vmul.f32 1.442695, %v674_v23  ;;  %v704_v19 = vmul.f32 1.442695, %v678_v26  ;;  %v673_v38 = vsub.f32 %v1404_v43, %v649_v12 }
 0x1c4   : > { %1142 = vpow2.f32 %v700_v18  ;;  %v677_v40 = vsub.f32 %v1408_v46, %v649_v12  ;;  %v681_v61 = vsub.f32 %v1424_v6, %v649_v12  ;;  %v685_v36 = vsub.f32 %v1436_v27, %v649_v12 }
 0x1c5   : > { %1144 = vpow2.f32 %v708_v17  ;;  %v689_v20 = vsub.f32 %v1446_v49, %v649_v12  ;;  %v712_v51 = vmul.f32 1.442695, %v682_v33  ;;  %v675_v56 = vsub.f32 %v1406_v16, %v671_v39 }
 0x1c6   : > { %1146 = vpow2.f32 %v716_v42  ;;  %v720_v41 = vmul.f32 1.442695, %v686_v35  ;;  %v728_v52 = vmul.f32 1.442695, %v690_v37  ;;  %v679_v29 = vsub.f32 %v1410_v47, %v671_v39 }
 0x1c7   : > { %1148 = vpow2.f32 %v724_v60  ;;  %v683_v43 = vsub.f32 %v1426_v7, %v671_v39  ;;  %v687_v46 = vsub.f32 %v1438_v28, %v671_v39  ;;  %v694_v6 = vmul.f32 1.442695, %v673_v38 }
 0x1c8   : > { %1150 = vpow2.f32 %v696_v48  ;;  %v691_v27 = vsub.f32 %v1448_v50, %v671_v39  ;;  %v702_v49 = vmul.f32 1.442695, %v677_v40  ;;  %v710_v30 = vmul.f32 1.442695, %v681_v61 }
 0x1c9   : > { %1152 = vpow2.f32 %v704_v19  ;;  %v718_v16 = vmul.f32 1.442695, %v685_v36  ;;  %v726_v54 = vmul.f32 1.442695, %v689_v20  ;;  %v698_v47 = vmul.f32 1.442695, %v675_v56 }
 0x1ca   : > { %1154 = vpow2.f32 %v712_v51  ;;  %v706_v50 = vmul.f32 1.442695, %v679_v29  ;;  %v714_v9 = vmul.f32 1.442695, %v683_v43  ;;  %v730_v5 = vmul.f32 1.442695, %v691_v27 }
 0x1cb   : > { %1156 = vpow2.f32 %v720_v41  ;;  %v722_v21 = vmul.f32 1.442695, %v687_v46 }
 0x1cc   : > { %1158 = vpow2.f32 %v728_v52 }
 0x1cd   : > { %v1476_v53 = vpop.eup %1140  ;;  %1160 = vpow2.f32 %v694_v6 }
 0x1ce   : > { %v1478_v59 = vpop.eup %1142  ;;  %1162 = vpow2.f32 %v702_v49 }
 0x1cf   : > { %v1480_v7 = vpop.eup %1144  ;;  %v732_v28 = vadd.f32 %v1478_v59, %v1476_v53  ;;  %1164 = vpow2.f32 %v710_v30 }
 0x1d0   : > { %v1484_v4 = vpop.eup %1146  ;;  %1166 = vpow2.f32 %v718_v16 }
 0x1d1   : > { %v1486_v31 = vpop.eup %1148  ;;  %v733_v32 = vadd.f32 %v1480_v7, %v732_v28  ;;  %1168 = vpow2.f32 %v726_v54 }
 0x1d2   : > { %v1489_v12 = vpop.eup %1150  ;;  %1170 = vpow2.f32 %v698_v47  ;;  %v735_v23 = vsel %vm630_vm10, %v1486_v31, 0.0 }
 0x1d3   : > { %v1491_v8 = vpop.eup %1152  ;;  %v734_v14 = vadd.f32 %v1484_v4, %v733_v32  ;;  %1172 = vpow2.f32 %v706_v50 }
 0x1d4   : > { %v1494_v22 = vpop.eup %1154  ;;  %v754_v26 = vadd.f32 %v1491_v8, %v1489_v12  ;;  %1174 = vpow2.f32 %v714_v9 }
 0x1d5   : > { %v1500_v33 = vpop.eup %1156  ;;  %v736_v34 = vadd.f32 %v735_v23, %v734_v14  ;;  %1176 = vpow2.f32 %v730_v5 }
 0x1d6   : > { %v1502_v18 = vpop.eup %1158  ;;  %v755_v17 = vadd.f32 %v1494_v22, %v754_v26  ;;  %1178 = vpow2.f32 %v722_v21 }
 0x1d7   : > { %v1505_v35 = vpop.eup %1160  ;;  %v737_v42 = vrot.slane %v736_v34, 4  ;;  %v757_v19 = vsel %vm630_vm10, %v1502_v18, 0.0 }
 0x1d8   : > { %v1507_v37 = vpop.eup %1162  ;;  %v756_v39 = vadd.f32 %v1500_v33, %v755_v17 }
 0x1d9   : > { %v1510_v60 = vpop.eup %1164  ;;  %v738_v48 = vadd.f32 %v737_v42, %v736_v34  ;;  %v743_v38 = vadd.f32 %v1507_v37, %v1505_v35 }
 0x1da   : > { %v1516_v40 = vpop.eup %1166  ;;  %v758_v61 = vadd.f32 %v757_v19, %v756_v39 }
 0x1db   : > { %v1518_v36 = vpop.eup %1168  ;;  %v739_v20 = vrot.slane %v738_v48, 2  ;;  %v744_v51 = vadd.f32 %v1510_v60, %v743_v38 }
 0x1dc   : > { %v1521_v56 = vpop.eup %1170  ;;  %v759_v41 = vrot.slane %v758_v61, 4  ;;  %v746_v6 = vsel %vm630_vm10, %v1518_v36, 0.0 }
 0x1dd   : > { %v1523_v52 = vpop.eup %1172  ;;  %v740_v29 = vadd.f32 %v739_v20, %v738_v48  ;;  %v745_v43 = vadd.f32 %v1516_v40, %v744_v51 }
 0x1de   : > { %v760_v46 = vadd.f32 %v759_v41, %v758_v61  ;;  %v765_v27 = vadd.f32 %v1523_v52, %v1521_v56  ;;  %v1530_v49 = vpop.eup %1174 }
 0x1df   : > { %v741_v30 = vrot.slane %v740_v29, 1  ;;  %v747_v16 = vadd.f32 %v746_v6, %v745_v43  ;;  %v1532_v54 = vpop.eup %1176 }
 0x1e0   : > { %v761_v47 = vrot.slane %v760_v46, 2  ;;  %v766_v28 = vadd.f32 %v1530_v49, %v765_v27  ;;  %v1535_v50 = vpop.eup %1178  ;;  %v768_v26 = vsel %vm630_vm10, %v1532_v54, 0.0 }
 0x1e1   : > { %v742_v32 = vadd.f32 %v741_v30, %v740_v29  ;;  %v748_v9 = vrot.slane %v747_v16, 4 }
 0x1e2   : > { %v762_v5 = vadd.f32 %v761_v47, %v760_v46  ;;  %v767_v14 = vadd.f32 %v1535_v50, %v766_v28 }
 0x1e3   : > { %v776_v21 = vmul.f32 0.25, %v742_v32  ;;  %v749_v23 = vadd.f32 %v748_v9, %v747_v16 }
 0x1e4   : > { %v763_v34 = vrot.slane %v762_v5, 1  ;;  %v769_v17 = vadd.f32 %v768_v26, %v767_v14 }
 0x1e5   : > { %1180 = vrcp.f32 %v776_v21  ;;  %v750_v42 = vrot.slane %v749_v23, 2 }
 0x1e6   : > { %v764_v39 = vadd.f32 %v763_v34, %v762_v5  ;;  %v770_v48 = vrot.slane %v769_v17, 4 }
 0x1e7   : > { %v751_v19 = vadd.f32 %v750_v42, %v749_v23 }
 0x1e8   : > { %v778_v38 = vmul.f32 0.25, %v764_v39  ;;  %v771_v61 = vadd.f32 %v770_v48, %v769_v17 }
 0x1e9   : > { %v752_v20 = vrot.slane %v751_v19, 1 }
 0x1ea   : > { %1182 = vrcp.f32 %v778_v38  ;;  %v772_v51 = vrot.slane %v771_v61, 2 }
 0x1eb   : > { %v753_v41 = vadd.f32 %v752_v20, %v751_v19  ;;  %v1607_v20 = vld [vmem:[#allocation3_spill] sm:$0xff] }
 0x1ec   : > { %v773_v29 = vadd.f32 %v772_v51, %v771_v61 }
 0x1ed   : > { %v777_v43 = vmul.f32 0.25, %v753_v41 }
 0x1ee   : > { %v774_v46 = vrot.slane %v773_v29, 1 }
 0x1ef   : > { %v1181_v6 = vpop.eup %1180  ;;  %1184 = vrcp.f32 %v777_v43  ;;  %v836_v43 = vld [vmem:[%s1599_s3] sm:$0xf] }
 0x1f0   : > { %v775_v27 = vadd.f32 %v774_v46, %v773_v29  ;;  %v784_v30 = vmul.f32 %v1181_v6, %v1476_v53  ;;  %v788_v16 = vmul.f32 %v1181_v6, %v1478_v59  ;;  %v792_v47 = vmul.f32 %v1181_v6, %v1480_v7  ;;  %v1609_v29 = vld [vmem:[#allocation5_spill] sm:$0xff] }
 0x1f1   : > { %v796_v28 = vmul.f32 %v1181_v6, %v1484_v4  ;;  %v800_v32 = vmul.f32 %v1181_v6, %v1486_v31 }
 0x1f2   : > { %v779_v9 = vmul.f32 0.25, %v775_v27  ;;  %v804_v5 = vmul.f32 %v784_v30, %v1308_v24  ;;  %v808_v14 = vmul.f32 %v788_v16, %v1310_v25  ;;  %v812_v21 = vmul.f32 %v792_v47, %v1349_v10 }
 0x1f3   : > { %v816_v23 = vmul.f32 %v796_v28, %v1351_v11 }
 0x1f4   : > { %v1183_v26 = vpop.eup %1182  ;;  %1186 = vrcp.f32 %v779_v9  ;;  %v824_v53 = vpack.c.bf16 %v808_v14, %v804_v5 }
 0x1f5   : > { %v786_v59 = vmul.f32 %v1183_v26, %v1489_v12  ;;  %v790_v7 = vmul.f32 %v1183_v26, %v1491_v8  ;;  %v828_v34 = vpack.c.bf16 %v816_v23, %v812_v21  ;;  %v794_v4 = vmul.f32 %v1183_v26, %v1494_v22 }
 0x1f6   : > { %v798_v31 = vmul.f32 %v1183_v26, %v1500_v33  ;;  %v802_v24 = vmul.f32 %v1183_v26, %v1502_v18 }
 0x1f7   : > { %v806_v25 = vmul.f32 %v786_v59, %v1288_v0  ;;  %v810_v10 = vmul.f32 %v790_v7, %v1294_v3  ;;  %v814_v11 = vmul.f32 %v794_v4, %v1338_v57 }
 0x1f8   : > { %v818_v17 = vmul.f32 %v798_v31, %v1340_v58 }
 0x1f9   : > { %v1185_v42 = vpop.eup %1184  ;;  %v826_v39 = vpack.c.bf16 %v810_v10, %v806_v25 }
 0x1fa   : > { %v785_v12 = vmul.f32 %v1185_v42, %v1505_v35  ;;  %v789_v8 = vmul.f32 %v1185_v42, %v1507_v37  ;;  %v793_v22 = vmul.f32 %v1185_v42, %v1510_v60  ;;  %v797_v33 = vmul.f32 %v1185_v42, %v1516_v40 }
 0x1fb   : > { %v830_v48 = vpack.c.bf16 %v818_v17, %v814_v11  ;;  %v801_v18 = vmul.f32 %v1185_v42, %v1518_v36 }
 0x1fc   : > { %v805_v0 = vmul.f32 %v785_v12, %v1284_v62  ;;  %v809_v3 = vmul.f32 %v789_v8, %v1290_v1  ;;  %v813_v57 = vmul.f32 %v793_v22, %v1323_v44  ;;  %v817_v58 = vmul.f32 %v797_v33, %v1325_v45 }
 0x1fd   : > { %v821_v62 = vmul.f32 %v801_v18, %v1359_v15  ;;  %v820_v44 = vmul.f32 %v800_v32, %v1355_v13  ;;  %v1608_v15 = vld [vmem:[#allocation4_spill] sm:$0xff]  ;;  %v822_v13 = vmul.f32 %v802_v24, %v1609_v29 }
 0x1fe   : > { %v1187_v19 = vpop.eup %1186  ;;  %v825_v38 = vpack.c.bf16 %v809_v3, %v805_v0  ;;  %v829_v35 = vpack.c.bf16 %v817_v58, %v813_v57 }
 0x1ff   : > { %v787_v37 = vmul.f32 %v1187_v19, %v1521_v56  ;;  %v791_v60 = vmul.f32 %v1187_v19, %v1523_v52  ;;  %v795_v40 = vmul.f32 %v1187_v19, %v1530_v49  ;;  %v799_v61 = vmul.f32 %v1187_v19, %v1535_v50 }
 0x200   : > { %852 = vmatprep.subr.bf16.mxu0 %v825_v38  ;;  %v803_v1 = vmul.f32 %v1187_v19, %v1532_v54  ;;  %v833_v50 = vpack.c.bf16 %v821_v62, %v821_v62  ;;  %v832_v41 = vpack.c.bf16 %v820_v44, %v820_v44 }
 0x201   : > { %v807_v45 = vmul.f32 %v787_v37, %v1286_v63  ;;  %v811_v36 = vmul.f32 %v791_v60, %v1292_v2  ;;  %853 = vmatpush1.bf16.msra.mxu0 %v824_v53  ;;  %v815_v56 = vmul.f32 %v795_v40, %v1334_v55  ;;  %v819_v52 = vmul.f32 %v799_v61, %v1607_v20 }
 0x202   : > { %854 = vmatprep.subr.bf16.mxu0 %v829_v35  ;;  %v823_v54 = vmul.f32 %v803_v1, %v1608_v15  ;;  %v841_v63 = vsel %vm492_vm8, %v832_v41, 0  ;;  %v834_v55 = vpack.c.bf16 %v822_v13, %v822_v13 }
 0x203   : > { %v827_v49 = vpack.c.bf16 %v811_v36, %v807_v45  ;;  %v831_v51 = vpack.c.bf16 %v819_v52, %v815_v56 }
 0x204   : > { %v835_v2 = vpack.c.bf16 %v823_v54, %v823_v54  ;;  %v847_v46 = vsel %vm492_vm8, %v834_v55, 0 }
 0x205   : > { %893 = vmatprep.subr.bf16.mxu1 %v827_v49  ;;  %855 = vmatpush1.bf16.msra.mxu0 %v828_v34 }
 0x206   : > { %894 = vmatpush1.bf16.msra.mxu1 %v826_v39  ;;  %1026 = vmatprep.subr.msk.bf16.mxu0 %vm492_vm8, %v833_v50 }
 0x207   : > { %895 = vmatprep.subr.bf16.mxu1 %v831_v51 }
 0x209   : > { %857 = vmatpush1.bf16.msra.mxu0 %v841_v63 }
 0x20a   : > { %896 = vmatpush1.bf16.msra.mxu1 %v830_v48 }
 0x20b   : > { %1028 = vmatprep.subr.msk.bf16.mxu1 %vm492_vm8, %v835_v2 }
 0x20c   : > { %1027 = vmatmul.mubr.msk.bf16.vlgmr.msra.gmra.mrb[12].mxu0 %vm482_vm9, %v836_v43 }
 0x20e   : > { %898 = vmatpush1.bf16.msra.mxu1 %v847_v46 }
 0x211   : > { %1029 = vmatmul.mubr.msk.bf16.vlgmr.msra.gmra.mrb[12].mxu1 %vm482_vm9, %v836_v43 }
 0x2df   : > { %v886_v6 = vpop.f32.mrb[12].mxu0 }
 0x2e0   : > { %v888_v27 = vpop.f32.mrb[13].mxu0 }
 0x2e1   : > { %v1035_v30 = vpack.c.bf16 %v888_v27, %v886_v6  ;;  %v890_v16 = vpop.f32.mrb[14].mxu0 }
 0x2e2   : > { %v891_v47 = vpop.f32.mrb[15].mxu0 }
 0x2e3   : > { %950 = vst [vmem:[%s197_s26] sm:$0xff] %v1035_v30 }
 0x2e4   : > { %v927_v28 = vpop.f32.mrb[12].mxu1 }
 0x2e5   : > { %v929_v32 = vpop.f32.mrb[13].mxu1 }
 0x2e6   : > { %v1036_v9 = vpack.c.bf16 %v929_v32, %v927_v28  ;;  %v931_v5 = vpop.f32.mrb[14].mxu1 }
 0x2e7   : > { %v932_v14 = vpop.f32.mrb[15].mxu1 }
 0x2e8   : > { %951 = vst [vmem:[%s197_s26 + $0x8] sm:$0xff] %v1036_v9 }
 0x2e9 PF: > { %s14_s15 = sadd.s32 1, %s1194_s15  }
 0x2ea   : > { %p11_p4 = scmp.ge.s32.totalorder %s14_s15, 4  }
 0x2ec   :  { %13 = sbr.rel (!%p11_p4) target bundleno = 1 (0x1), region = 66 }

</bundles_post_ra>
